<compile_context>
chip_gen: v6e
topology: v6e:2x2x1
jax: 0.10.0
libtpu: 0.0.40
codegen_flags: <defaults>
</compile_context>

<pallas_src>
import jax
import jax.numpy as jnp
from jax.experimental import pallas as pl
from jax.experimental.pallas import tpu as pltpu


# Padded layer widths (multiples of 128 for clean lane tiling / full MXU passes).
H1_PAD = 512   # fc1_units 400 -> 512
H2_PAD = 384   # fc2_units 300 -> 384 (3x128; do NOT pad to 512 -- see header note)
A_PAD = 128    # action_size packed into a lane-dense 128-wide output slab


def _round_up(x, m):
    return ((x + m - 1) // m) * m


def actor_kernel(x_ref, w1_ref, b1_ref, w2_ref, b2_ref, w3_ref, b3_ref, out_ref):
    # One batch tile per grid step. Weights/biases use constant index maps, so they
    # are DMA'd into VMEM once and stay resident across all grid steps.
    x = x_ref[...]                                  # bf16, lane-dense padded tile

    # fc1 + ReLU (bf16 MXU inputs, f32 accumulation, f32 elementwise; biases are f32)
    h1 = jnp.dot(x, w1_ref[...], preferred_element_type=jnp.float32)
    h1 = jnp.maximum(h1 + b1_ref[...], 0.0)

    # fc2 + ReLU
    h2 = jnp.dot(h1.astype(jnp.bfloat16), w2_ref[...],
                 preferred_element_type=jnp.float32)
    h2 = jnp.maximum(h2 + b2_ref[...], 0.0)

    # fc3 + tanh (tanh in f32; padded columns are exactly tanh(0)=0)
    h3 = jnp.dot(h2.astype(jnp.bfloat16), w3_ref[...],
                 preferred_element_type=jnp.float32)
    h3 = h3 + b3_ref[...]
    out_ref[...] = jnp.tanh(h3).astype(out_ref.dtype)


def actor_forward(state, packed, action_size, block_m=1024):
    """state: [B, state_size] float32. packed: padded params (bf16 weights, f32 biases)."""
    w1, b1 = packed["w1"], packed["b1"]
    w2, b2 = packed["w2"], packed["b2"]
    w3, b3 = packed["w3"], packed["b3"]

    B, S = state.shape
    s_pad = w1.shape[0]
    assert S <= s_pad, "state feature dim larger than packed w1 input dim"

    # Batch tile selection:
    #  - as large as possible (amortize per-step pipeline overhead),
    #  - >= 2 grid steps whenever the batch spans more than one sublane row, so both
    #    v7x TensorCores get work on the "parallel" batch axis,
    #  - multiple of 8 (sublanes), capped at 2048 for v7x VMEM headroom.
    bp8 = _round_up(B, 8)
    tm = max(8, _round_up(pl.cdiv(bp8, 2), 8))
    tm = min(tm, block_m, 2048)
    bp = _round_up(B, tm)

    # Pad batch + feature dims and pre-cast to bf16 (halves activation DMA). Padded
    # entries are zero and w1's padded input rows are zero, so results are unchanged.
    x = state.astype(jnp.bfloat16)
    if bp != B or s_pad != S:
        x = jnp.pad(x, ((0, bp - B), (0, s_pad - S)))

    grid = (bp // tm,)

    def const_spec(arr):
        # Constant index_map -> fetched into VMEM once, resident across grid steps.
        return pl.BlockSpec(arr.shape, lambda i: (0, 0))

    out = pl.pallas_call(
        actor_kernel,
        out_shape=jax.ShapeDtypeStruct((bp, A_PAD), jnp.float32),
        grid=grid,
        in_specs=[
            pl.BlockSpec((tm, s_pad), lambda i: (i, 0)),   # batch-tiled activations
            const_spec(w1), const_spec(b1),
            const_spec(w2), const_spec(b2),
            const_spec(w3), const_spec(b3),
        ],
        out_specs=pl.BlockSpec((tm, A_PAD), lambda i: (i, 0)),
        compiler_params=pltpu.CompilerParams(
            dimension_semantics=("parallel",),             # shard batch across TCs (v7x)
        ),
    )(x, w1, b1, w2, b2, w3, b3)

    # Strip batch padding and the lane-dense output padding.
    return out[:B, :action_size]


def init_actor_params(key, state_size, action_size, fc1_units=400, fc2_units=300):
    """PyTorch nn.Linear-style U(-1/sqrt(fan_in), +1/sqrt(fan_in)) init, float32, unpadded."""
    ks = jax.random.split(key, 6)

    def linear(kw, kb, fan_in, fan_out):
        bound = 1.0 / (fan_in ** 0.5)
        w = jax.random.uniform(kw, (fan_in, fan_out), jnp.float32, -bound, bound)
        b = jax.random.uniform(kb, (fan_out,), jnp.float32, -bound, bound)
        return w, b

    w1, b1 = linear(ks[0], ks[1], state_size, fc1_units)
    w2, b2 = linear(ks[2], ks[3], fc1_units, fc2_units)
    w3, b3 = linear(ks[4], ks[5], fc2_units, action_size)
    return {"w1": w1, "b1": b1, "w2": w2, "b2": b2, "w3": w3, "b3": b3}


def pack_actor_params(params):
    """Zero-pad to TPU-friendly widths. Weights -> bf16 (MXU inputs), biases -> f32.
    Padded input rows / output columns are zero so they stay exactly zero through
    ReLU / tanh and the math is unchanged."""
    def pack(w, b, pad_in, pad_out):
        fi, fo = w.shape
        wp = jnp.pad(w, ((0, pad_in - fi), (0, pad_out - fo))).astype(jnp.bfloat16)
        bp = jnp.pad(b.reshape(1, -1), ((0, 0), (0, pad_out - fo))).astype(jnp.float32)
        return wp, bp

    s_pad = _round_up(params["w1"].shape[0], 128)
    w1, b1 = pack(params["w1"], params["b1"], s_pad, H1_PAD)
    w2, b2 = pack(params["w2"], params["b2"], H1_PAD, H2_PAD)
    w3, b3 = pack(params["w3"], params["b3"], H2_PAD, A_PAD)
    return {"w1": w1, "b1": b1, "w2": w2, "b2": b2, "w3": w3, "b3": b3}


def _ref_f32(state, params):
    """Pure-f32 JAX reference matching the PyTorch module's math."""
    h1 = jnp.maximum(state @ params["w1"] + params["b1"], 0.0)
    h2 = jnp.maximum(h1 @ params["w2"] + params["b2"], 0.0)
    return jnp.tanh(h2 @ params["w3"] + params["b3"])


def _ref_kernel_math(state, packed, action_size):
    """Pure-JAX reference reproducing the kernel's bf16-weight / f32-accumulate math."""
    s_pad = packed["w1"].shape[0]
    x = jnp.pad(state.astype(jnp.bfloat16), ((0, 0), (0, s_pad - state.shape[1])))
    h1 = jnp.maximum(
        jnp.dot(x, packed["w1"], preferred_element_type=jnp.float32) + packed["b1"], 0.0)
    h2 = jnp.maximum(
        jnp.dot(h1.astype(jnp.bfloat16), packed["w2"],
                preferred_element_type=jnp.float32) + packed["b2"], 0.0)
    h3 = (jnp.dot(h2.astype(jnp.bfloat16), packed["w3"],
                  preferred_element_type=jnp.float32) + packed["b3"])
    return jnp.tanh(h3)[:, :action_size]


if __name__ == "__main__":
    key = jax.random.PRNGKey(0)
    k_param, k_state = jax.random.split(key)

    # Small shapes consistent with the module (Reacher-like: state=24, action=4).
    batch = 8
    state_size = 24
    action_size = 4

    params = init_actor_params(k_param, state_size, action_size)
    packed = pack_actor_params(params)
    state = jax.random.normal(k_state, (batch, state_size), jnp.float32)

    out = actor_forward(state, packed, action_size)
    out = jax.block_until_ready(out)

    assert out.shape == (batch, action_size)
    assert bool(jnp.all(jnp.isfinite(out)))

    # Exact-math check (same bf16 weights / f32 accumulation as the kernel).
    ref_k = _ref_kernel_math(state, packed, action_size)
    assert jnp.allclose(out, ref_k, atol=2e-4, rtol=2e-4)

    # Fidelity check vs. the pure-f32 PyTorch-equivalent math (bf16 weight storage
    # introduces ~0.2-0.5% relative error, so use a correspondingly loose tolerance).
    ref_f = _ref_f32(state, params)
    assert jnp.allclose(out, ref_f, atol=2e-2, rtol=2e-2)

    print("KERNEL_OK")
</pallas_src>

<mosaic_0001>
module attributes {stable_mosaic.version = 11 : i64} {
  func.func @actor_kernel(%arg0: i32, %arg1: memref<8x128xbf16, #tpu.memory_space<vmem>>, %arg2: memref<128x512xbf16, #tpu.memory_space<vmem>>, %arg3: memref<1x512xf32, #tpu.memory_space<vmem>>, %arg4: memref<512x384xbf16, #tpu.memory_space<vmem>>, %arg5: memref<1x384xf32, #tpu.memory_space<vmem>>, %arg6: memref<384x128xbf16, #tpu.memory_space<vmem>>, %arg7: memref<1x128xf32, #tpu.memory_space<vmem>>, %arg8: memref<8x128xf32, #tpu.memory_space<vmem>>) attributes {dimension_semantics = [#tpu.dimension_semantics<parallel>], iteration_bounds = array<i64: 1>, scalar_prefetch = 0 : i64, scratch_operands = 0 : i64, tpu.core_type = #tpu.core_type<tc>, window_params = [{transform_indices = @transform_0, window_bounds = array<i64: 8, 128>}, {pipeline_mode = #tpu.pipeline_mode<synchronous>, transform_indices = @transform_1, window_bounds = array<i64: 128, 512>}, {pipeline_mode = #tpu.pipeline_mode<synchronous>, transform_indices = @transform_2, window_bounds = array<i64: 1, 512>}, {pipeline_mode = #tpu.pipeline_mode<synchronous>, transform_indices = @transform_3, window_bounds = array<i64: 512, 384>}, {pipeline_mode = #tpu.pipeline_mode<synchronous>, transform_indices = @transform_4, window_bounds = array<i64: 1, 384>}, {pipeline_mode = #tpu.pipeline_mode<synchronous>, transform_indices = @transform_5, window_bounds = array<i64: 384, 128>}, {pipeline_mode = #tpu.pipeline_mode<synchronous>, transform_indices = @transform_6, window_bounds = array<i64: 1, 128>}, {transform_indices = @transform_7, window_bounds = array<i64: 8, 128>}]} {
    %c0 = arith.constant 0 : index
    %c0_0 = arith.constant 0 : index
    %0 = vector.load %arg1[%c0, %c0_0] : memref<8x128xbf16, #tpu.memory_space<vmem>>, vector<8x128xbf16>
    %c0_1 = arith.constant 0 : index
    %c0_2 = arith.constant 0 : index
    %1 = vector.load %arg2[%c0_1, %c0_2] : memref<128x512xbf16, #tpu.memory_space<vmem>>, vector<128x512xbf16>
    %cst = arith.constant dense<0.000000e+00> : vector<8x512xf32>
    %2 = tpu.matmul %0, %1, %cst {dimension_numbers = #tpu.dot_dimension_numbers<[1], [0], [0], [1], [0, 0, 1, 1], [], []>} : vector<8x128xbf16>, vector<128x512xbf16>, vector<8x512xf32> -> vector<8x512xf32>
    %c0_3 = arith.constant 0 : index
    %c0_4 = arith.constant 0 : index
    %3 = vector.load %arg3[%c0_3, %c0_4] : memref<1x512xf32, #tpu.memory_space<vmem>>, vector<1x512xf32>
    %4 = vector.broadcast %3 : vector<1x512xf32> to vector<8x512xf32>
    %5 = arith.addf %2, %4 : vector<8x512xf32>
    %cst_5 = arith.constant 0.000000e+00 : f32
    %6 = vector.broadcast %cst_5 : f32 to vector<8x512xf32>
    %7 = arith.maximumf %5, %6 : vector<8x512xf32>
    %8 = arith.truncf %7 : vector<8x512xf32> to vector<8x512xbf16>
    %c0_6 = arith.constant 0 : index
    %c0_7 = arith.constant 0 : index
    %9 = vector.load %arg4[%c0_6, %c0_7] : memref<512x384xbf16, #tpu.memory_space<vmem>>, vector<512x384xbf16>
    %cst_8 = arith.constant dense<0.000000e+00> : vector<8x384xf32>
    %10 = tpu.matmul %8, %9, %cst_8 {dimension_numbers = #tpu.dot_dimension_numbers<[1], [0], [0], [1], [0, 0, 1, 1], [], []>} : vector<8x512xbf16>, vector<512x384xbf16>, vector<8x384xf32> -> vector<8x384xf32>
    %c0_9 = arith.constant 0 : index
    %c0_10 = arith.constant 0 : index
    %11 = vector.load %arg5[%c0_9, %c0_10] : memref<1x384xf32, #tpu.memory_space<vmem>>, vector<1x384xf32>
    %12 = vector.broadcast %11 : vector<1x384xf32> to vector<8x384xf32>
    %13 = arith.addf %10, %12 : vector<8x384xf32>
    %cst_11 = arith.constant 0.000000e+00 : f32
    %14 = vector.broadcast %cst_11 : f32 to vector<8x384xf32>
    %15 = arith.maximumf %13, %14 : vector<8x384xf32>
    %16 = arith.truncf %15 : vector<8x384xf32> to vector<8x384xbf16>
    %c0_12 = arith.constant 0 : index
    %c0_13 = arith.constant 0 : index
    %17 = vector.load %arg6[%c0_12, %c0_13] : memref<384x128xbf16, #tpu.memory_space<vmem>>, vector<384x128xbf16>
    %cst_14 = arith.constant dense<0.000000e+00> : vector<8x128xf32>
    %18 = tpu.matmul %16, %17, %cst_14 {dimension_numbers = #tpu.dot_dimension_numbers<[1], [0], [0], [1], [0, 0, 1, 1], [], []>} : vector<8x384xbf16>, vector<384x128xbf16>, vector<8x128xf32> -> vector<8x128xf32>
    %c0_15 = arith.constant 0 : index
    %c0_16 = arith.constant 0 : index
    %19 = vector.load %arg7[%c0_15, %c0_16] : memref<1x128xf32, #tpu.memory_space<vmem>>, vector<1x128xf32>
    %20 = vector.broadcast %19 : vector<1x128xf32> to vector<8x128xf32>
    %21 = arith.addf %18, %20 : vector<8x128xf32>
    %22 = math.tanh %21 : vector<8x128xf32>
    %c0_17 = arith.constant 0 : index
    %c0_18 = arith.constant 0 : index
    %23 = vector.load %arg8[%c0_17, %c0_18] : memref<8x128xf32, #tpu.memory_space<vmem>>, vector<8x128xf32>
    tpu.vector_store %arg8[%c0_17, %c0_18], %22 {strides = array<i32>} : memref<8x128xf32, #tpu.memory_space<vmem>>, vector<8x128xf32>,
    return
  }
  func.func @transform_0(%arg0: i32) -> (i32, i32) {
    %c0_i32 = arith.constant 0 : i32
    %c0_i32_0 = arith.constant 0 : i32
    return %arg0, %c0_i32 : i32, i32
  }
  func.func @transform_1(%arg0: i32) -> (i32, i32) {
    %c0_i32 = arith.constant 0 : i32
    %c0_i32_0 = arith.constant 0 : i32
    %c0_i32_1 = arith.constant 0 : i32
    return %c0_i32, %c0_i32_0 : i32, i32
  }
  func.func @transform_2(%arg0: i32) -> (i32, i32) {
    %c0_i32 = arith.constant 0 : i32
    %c0_i32_0 = arith.constant 0 : i32
    %c0_i32_1 = arith.constant 0 : i32
    return %c0_i32, %c0_i32_0 : i32, i32
  }
  func.func @transform_3(%arg0: i32) -> (i32, i32) {
    %c0_i32 = arith.constant 0 : i32
    %c0_i32_0 = arith.constant 0 : i32
    %c0_i32_1 = arith.constant 0 : i32
    return %c0_i32, %c0_i32_0 : i32, i32
  }
  func.func @transform_4(%arg0: i32) -> (i32, i32) {
    %c0_i32 = arith.constant 0 : i32
    %c0_i32_0 = arith.constant 0 : i32
    %c0_i32_1 = arith.constant 0 : i32
    return %c0_i32, %c0_i32_0 : i32, i32
  }
  func.func @transform_5(%arg0: i32) -> (i32, i32) {
    %c0_i32 = arith.constant 0 : i32
    %c0_i32_0 = arith.constant 0 : i32
    %c0_i32_1 = arith.constant 0 : i32
    return %c0_i32, %c0_i32_0 : i32, i32
  }
  func.func @transform_6(%arg0: i32) -> (i32, i32) {
    %c0_i32 = arith.constant 0 : i32
    %c0_i32_0 = arith.constant 0 : i32
    %c0_i32_1 = arith.constant 0 : i32
    return %c0_i32, %c0_i32_0 : i32, i32
  }
  func.func @transform_7(%arg0: i32) -> (i32, i32) {
    %c0_i32 = arith.constant 0 : i32
    %c0_i32_0 = arith.constant 0 : i32
    return %arg0, %c0_i32 : i32, i32
  }
}

</mosaic_0001>

<bundles_post_ra>
// kernel: tpu_custom_call.1
= control target key start
LH: loop header
LB: loop body
LE: loop exit
PB: predicated region body
PF: predicated region fallthrough
CT: control target
= control target key end

     0   :  { %12 = vsyncpa [#allocation3], 0  ;;  %s2218_s0 = inlined_call_operand.hbm [shape: bf16[8,128], index: 0, kind: input, shape index: {}]   ;;  %s2219_s1 = inlined_call_operand.hbm [shape: bf16[128,512], index: 1, kind: input, shape index: {}]   ;;  %s2220_s2 = inlined_call_operand.hbm [shape: f32[1,512], index: 2, kind: input, shape index: {}]   ;;  %s2221_s3 = inlined_call_operand.hbm [shape: bf16[512,384], index: 3, kind: input, shape index: {}]   ;;  %s2222_s4 = inlined_call_operand.vmem [shape: f32[1,384], index: 4, kind: input, shape index: {}]   ;;  %s2223_s5 = inlined_call_operand.hbm [shape: bf16[384,128], index: 5, kind: input, shape index: {}]   ;;  %s2224_s6 = inlined_call_operand.vmem [shape: f32[1,128], index: 6, kind: input, shape index: {}]   ;;  %s2225_s7 = inlined_call_operand.hbm [shape: f32[8,128], index: 7, kind: output, shape index: {}]  }
   0x1   :  { %13 = vsyncpa [#allocation6], 0 }
   0x2   :  { %14 = vsyncpa [#allocation9], 0 }
   0x3   :  { %15 = vsyncpa [#allocation4], 0  ;;  %s2113_s24 = smov [#allocation5]  }
   0x4   :  { %s31_s25 = sshll.u32 %s2113_s24, 4  ;;  %s32_s25 = int_to_ptr.vmem [resolvable:$true] %s31_s25 }
   0x5   :  { %s1993_s26 = scalar_lea.vmem %s32_s25, 4096  ;;  %p1998_p1 = scmp.lt.s32.totalorder %s32_s25, %s32_s25 }
   0x6   :  { %p1994_p0 = scmp.ne.s32.totalorder %s32_s25, %s1993_s26  ;;  %p1999_p2 = scmp.lt.s32.totalorder %s1993_s26, %s1993_s26 }
   0x8   :  { %p2000_p3 = por %p1999_p2, %p1998_p1 }
   0xa   :  { %p2001_p4 = pnand %p2000_p3, %p1994_p0 }
   0xc   :  { %2004 = shalt.err (!%p2001_p4)
}
   0xd   :  { %s2114_s27 = smov 256   ;;  %s2115_s28 = smov 16  }
   0xe   :  { %37 = dma.hbm_to_vmem [thread:$0]  %s2219_s1, 4096, %s32_s25, [#allocation6], %s2114_s27, %s2114_s27, %s2115_s28  }
   0xf   :  { %s2116_s8 = smov [#allocation8]  }
  0x10   :  { %s53_s9 = sshll.u32 %s2116_s8, 4  ;;  %s54_s9 = int_to_ptr.vmem [resolvable:$true] %s53_s9 }
  0x11   :  { %s2013_s10 = scalar_lea.vmem %s54_s9, 12288  ;;  %p2018_p6 = scmp.lt.s32.totalorder %s54_s9, %s54_s9 }
  0x12   :  { %p2014_p5 = scmp.ne.s32.totalorder %s54_s9, %s2013_s10  ;;  %p2019_p7 = scmp.lt.s32.totalorder %s2013_s10, %s2013_s10 }
  0x14   :  { %p2020_p8 = por %p2019_p7, %p2018_p6 }
  0x16   :  { %p2021_p9 = pnand %p2020_p8, %p2014_p5 }
  0x18   :  { %2024 = shalt.err (!%p2021_p9)
}
  0x19   :  { %s2117_s11 = smov 192   ;;  %s2118_s12 = smov 12  }
  0x1a   :  { %59 = dma.hbm_to_vmem [thread:$0]  %s2221_s3, 12288, %s54_s9, [#allocation9], %s2117_s11, %s2117_s11, %s2118_s12  }
  0x1b   :  { %s2119_s15 = smov [#allocation2]   ;;  %s2120_s17 = smov [#allocation7]  }
  0x1c   :  { %s22_s16 = sshll.u32 %s2119_s15, 4  ;;  %s44_s1 = sshll.u32 %s2120_s17, 4  ;;  %s23_s16 = int_to_ptr.vmem [resolvable:$true] %s22_s16  ;;  %s45_s1 = int_to_ptr.vmem [resolvable:$true] %s44_s1 }
  0x1d   :  { %s2033_s18 = scalar_lea.vmem %s23_s16, 64  ;;  %p2038_p11 = scmp.lt.s32.totalorder %s23_s16, %s23_s16 }
  0x1e   :  { %p2034_p10 = scmp.ne.s32.totalorder %s23_s16, %s2033_s18  ;;  %p2039_p12 = scmp.lt.s32.totalorder %s2033_s18, %s2033_s18 }
  0x20   :  { %p2040_p13 = por %p2039_p12, %p2038_p11 }
  0x22   :  { %p2041_p0 = pnand %p2040_p13, %p2034_p10 }
  0x24   :  { %2044 = shalt.err (!%p2041_p0)
}
  0x25   :  { %25 = dma.hbm_to_vmem [thread:$0]  %s2218_s0, 64, %s23_s16, [#allocation3]  }
  0x26   :  { %s2053_s21 = scalar_lea.vmem %s45_s1, 64  ;;  %p2058_p2 = scmp.lt.s32.totalorder %s45_s1, %s45_s1 }
  0x27   :  { %p2054_p1 = scmp.ne.s32.totalorder %s45_s1, %s2053_s21  ;;  %p2059_p3 = scmp.lt.s32.totalorder %s2053_s21, %s2053_s21 }
  0x29   :  { %p2060_p4 = por %p2059_p3, %p2058_p2 }
  0x2b   :  { %p2061_p5 = pnand %p2060_p4, %p2054_p1 }
  0x2d   :  { %2064 = shalt.err (!%p2061_p5)
}
  0x2e   :  { %47 = dma.hbm_to_vmem [thread:$0]  %s2220_s2, 64, %s45_s1, [#allocation6]  }
  0x2f   :  { %s2121_s23 = smov [#allocation10]  }
  0x30   :  { %s67_s24 = sshll.u32 %s2121_s23, 4  ;;  %s68_s24 = int_to_ptr.vmem [resolvable:$true] %s67_s24 }
  0x31   :  { %s2073_s25 = scalar_lea.vmem %s68_s24, 3072  ;;  %p2078_p7 = scmp.lt.s32.totalorder %s68_s24, %s68_s24 }
  0x32   :  { %p2074_p6 = scmp.ne.s32.totalorder %s68_s24, %s2073_s25  ;;  %p2079_p8 = scmp.lt.s32.totalorder %s2073_s25, %s2073_s25 }
  0x34   :  { %p2080_p9 = por %p2079_p8, %p2078_p7 }
  0x36   :  { %p2081_p10 = pnand %p2080_p9, %p2074_p6 }
  0x38   :  { %2084 = shalt.err (!%p2081_p10)
}
  0x39   :  { %s2122_s0 = smov 64   ;;  %s2123_s26 = smov 4  }
  0x3a   :  { %73 = dma.hbm_to_vmem [thread:$0]  %s2223_s5, 3072, %s68_s24, [#allocation9], %s2122_s0, %s2122_s0, %s2123_s26  }
  0x3b   :  { %2105 = dma.done.wait [#allocation3], 64  }
  0x3c   :  { %2106 = vsyncadd [#allocation3], 4294967232 }
  0x3d   :  { %2107 = dma.done.wait [#allocation6], 4160  }
  0x3e   :  { %2108 = vsyncadd [#allocation6], 4294963136 }
  0x3f   :  { %2109 = dma.done.wait [#allocation9], 15360  }
  0x40   :  { %2110 = vsyncadd [#allocation9], 4294951936  ;;  %v2124_v0 = vmov 0   ;;  %v1783_v1 = vld [vmem:[#allocation5 + $0xe4] ss:$16 sps:$4 sm:$0xff]   ;;  %vm2126_vm0 = vmmov 0  }
  0x41   :  { %339 = vmatprep.mubr.bf16.mxu0 %v2124_v0  ;;  %380 = vmatprep.mubr.bf16.mxu1 %v2124_v0  ;;  %v1785_v2 = vld [vmem:[#allocation5 + $0xec] ss:$16 sps:$4 sm:$0xff]   ;;  %v1787_v3 = vld [vmem:[#allocation5 + $0xe0] ss:$16 sps:$4 sm:$0xff]   ;;  %v1788_v4 = vld [vmem:[#allocation5 + $0xe8] ss:$16 sps:$4 sm:$0xff]  }
  0x42   :  { %307 = vmatprep.subr.bf16.mxu0 %v1783_v1  ;;  %348 = vmatprep.subr.bf16.mxu1 %v1785_v2  ;;  %v1789_v5 = vld [vmem:[#allocation5 + $0xc4] ss:$16 sps:$4 sm:$0xff]   ;;  %v1791_v6 = vld [vmem:[#allocation5 + $0xcc] ss:$16 sps:$4 sm:$0xff]   ;;  %v1793_v7 = vld [vmem:[#allocation5 + $0xc0] ss:$16 sps:$4 sm:$0xff]  }
  0x43   :  { %308 = vmatpush1.bf16.msra.mxu0 %v1787_v3  ;;  %349 = vmatpush1.bf16.msra.mxu1 %v1788_v4  ;;  %v1794_v8 = vld [vmem:[#allocation5 + $0xc8] ss:$16 sps:$4 sm:$0xff]   ;;  %v1795_v9 = vld [vmem:[#allocation5 + $0xa4] ss:$16 sps:$4 sm:$0xff]   ;;  %v1797_v10 = vld [vmem:[#allocation5 + $0xac] ss:$16 sps:$4 sm:$0xff]  }
  0x44   :  { %309 = vmatprep.subr.bf16.mxu0 %v1789_v5  ;;  %350 = vmatprep.subr.bf16.mxu1 %v1791_v6  ;;  %v1799_v11 = vld [vmem:[#allocation5 + $0xa0] ss:$16 sps:$4 sm:$0xff]   ;;  %v1800_v12 = vld [vmem:[#allocation5 + $0xa8] ss:$16 sps:$4 sm:$0xff]   ;;  %v1801_v13 = vld [vmem:[#allocation5 + $0x84] ss:$16 sps:$4 sm:$0xff]  }
  0x45   :  { %v1803_v14 = vld [vmem:[#allocation5 + $0x8c] ss:$16 sps:$4 sm:$0xff]   ;;  %v1805_v15 = vld [vmem:[#allocation5 + $0x80] ss:$16 sps:$4 sm:$0xff]   ;;  %v1806_v16 = vld [vmem:[#allocation5 + $0x88] ss:$16 sps:$4 sm:$0xff]  }
  0x46   :  { %v1807_v17 = vld [vmem:[#allocation5 + $0x64] ss:$16 sps:$4 sm:$0xff]   ;;  %v1809_v18 = vld [vmem:[#allocation5 + $0x6c] ss:$16 sps:$4 sm:$0xff]   ;;  %v1811_v19 = vld [vmem:[#allocation5 + $0x60] ss:$16 sps:$4 sm:$0xff]  }
  0x47   :  { %310 = vmatpush1.bf16.msra.mxu0 %v1793_v7  ;;  %351 = vmatpush1.bf16.msra.mxu1 %v1794_v8  ;;  %v1812_v20 = vld [vmem:[#allocation5 + $0x68] ss:$16 sps:$4 sm:$0xff]   ;;  %v1813_v21 = vld [vmem:[#allocation5 + $0x44] ss:$16 sps:$4 sm:$0xff]   ;;  %v1815_v22 = vld [vmem:[#allocation5 + $0x4c] ss:$16 sps:$4 sm:$0xff]  }
  0x48   :  { %311 = vmatprep.subr.bf16.mxu0 %v1795_v9  ;;  %352 = vmatprep.subr.bf16.mxu1 %v1797_v10  ;;  %v1817_v23 = vld [vmem:[#allocation5 + $0x40] ss:$16 sps:$4 sm:$0xff]   ;;  %v1818_v24 = vld [vmem:[#allocation5 + $0x48] ss:$16 sps:$4 sm:$0xff]   ;;  %v1819_v25 = vld [vmem:[#allocation5 + $0x24] ss:$16 sps:$4 sm:$0xff]  }
  0x49   :  { %v1821_v26 = vld [vmem:[#allocation5 + $0x2c] ss:$16 sps:$4 sm:$0xff]   ;;  %v1823_v27 = vld [vmem:[#allocation5 + $0x20] ss:$16 sps:$4 sm:$0xff]   ;;  %v1824_v28 = vld [vmem:[#allocation5 + $0x28] ss:$16 sps:$4 sm:$0xff]  }
  0x4a   :  { %v1825_v29 = vld [vmem:[#allocation5 + $0x4] ss:$16 sps:$4 sm:$0xff]   ;;  %v1827_v30 = vld [vmem:[#allocation5 + $0xc] ss:$16 sps:$4 sm:$0xff]   ;;  %v1829_v31 = vld [vmem:[#allocation5] ss:$16 sps:$4 sm:$0xff]  }
  0x4b   :  { %312 = vmatpush1.bf16.msra.mxu0 %v1799_v11  ;;  %353 = vmatpush1.bf16.msra.mxu1 %v1800_v12  ;;  %v1830_v32 = vld [vmem:[#allocation5 + $0x8] ss:$16 sps:$4 sm:$0xff]   ;;  %v1833_v33 = vld [vmem:[#allocation8 + $0xac] ss:$12 sps:$4 sm:$0xff]   ;;  %v1837_v40 = vld [vmem:[#allocation8 + $0x90] ss:$12 sps:$4 sm:$0xff]  }
  0x4c   :  { %313 = vmatprep.subr.bf16.mxu0 %v1801_v13  ;;  %354 = vmatprep.subr.bf16.mxu1 %v1803_v14  ;;  %v1836_v34 = vld [vmem:[#allocation8 + $0x22c] ss:$12 sps:$4 sm:$0xff]   ;;  %v1831_v36 = vld [vmem:[#allocation8 + $0xa8] ss:$12 sps:$4 sm:$0xff]   ;;  %v1840_v41 = vld [vmem:[#allocation8 + $0x210] ss:$12 sps:$4 sm:$0xff]  }
  0x4d   :  { %v92_v35 = vld [vmem:[#allocation2] sm:$0xf]  ;;  %v1834_v37 = vld [vmem:[#allocation8 + $0x228] ss:$12 sps:$4 sm:$0xff]   ;;  %v1851_v46 = vld [vmem:[#allocation8 + $0x64] ss:$12 sps:$4 sm:$0xff]  }
  0x4e   :  { %v1839_v38 = vld [vmem:[#allocation8 + $0x94] ss:$12 sps:$4 sm:$0xff]   ;;  %v1845_v42 = vld [vmem:[#allocation8 + $0x7c] ss:$12 sps:$4 sm:$0xff]   ;;  %v1843_v44 = vld [vmem:[#allocation8 + $0x78] ss:$12 sps:$4 sm:$0xff]  }
  0x4f   :  { %314 = vmatpush1.bf16.msra.mxu0 %v1805_v15  ;;  %355 = vmatpush1.bf16.msra.mxu1 %v1806_v16  ;;  %v1842_v39 = vld [vmem:[#allocation8 + $0x214] ss:$12 sps:$4 sm:$0xff]   ;;  %v1848_v43 = vld [vmem:[#allocation8 + $0x1fc] ss:$12 sps:$4 sm:$0xff]   ;;  %v1846_v45 = vld [vmem:[#allocation8 + $0x1f8] ss:$12 sps:$4 sm:$0xff]  }
  0x50   :  { %315 = vmatprep.subr.bf16.mxu0 %v1807_v17  ;;  %356 = vmatprep.subr.bf16.mxu1 %v1809_v18  ;;  %v1854_v47 = vld [vmem:[#allocation8 + $0x1e4] ss:$12 sps:$4 sm:$0xff]   ;;  %v1849_v48 = vld [vmem:[#allocation8 + $0x60] ss:$12 sps:$4 sm:$0xff]   ;;  %v1855_v52 = vld [vmem:[#allocation8 + $0x48] ss:$12 sps:$4 sm:$0xff]  }
  0x51   :  { %v1852_v49 = vld [vmem:[#allocation8 + $0x1e0] ss:$12 sps:$4 sm:$0xff]   ;;  %v1858_v53 = vld [vmem:[#allocation8 + $0x1c8] ss:$12 sps:$4 sm:$0xff]   ;;  %v1861_v56 = vld [vmem:[#allocation8 + $0x30] ss:$12 sps:$4 sm:$0xff]  }
  0x52   :  { %v1857_v50 = vld [vmem:[#allocation8 + $0x4c] ss:$12 sps:$4 sm:$0xff]   ;;  %v1863_v54 = vld [vmem:[#allocation8 + $0x34] ss:$12 sps:$4 sm:$0xff]   ;;  %v1864_v57 = vld [vmem:[#allocation8 + $0x1b0] ss:$12 sps:$4 sm:$0xff]  }
  0x53   :  { %316 = vmatpush1.bf16.msra.mxu0 %v1811_v19  ;;  %357 = vmatpush1.bf16.msra.mxu1 %v1812_v20  ;;  %v1860_v51 = vld [vmem:[#allocation8 + $0x1cc] ss:$12 sps:$4 sm:$0xff]   ;;  %v1866_v55 = vld [vmem:[#allocation8 + $0x1b4] ss:$12 sps:$4 sm:$0xff]   ;;  %v1869_v58 = vld [vmem:[#allocation8 + $0x1c] ss:$12 sps:$4 sm:$0xff]  }
  0x54   :  { %317 = vmatprep.subr.bf16.mxu0 %v1813_v21  ;;  %358 = vmatprep.subr.bf16.mxu1 %v1815_v22  ;;  %v1872_v59 = vld [vmem:[#allocation8 + $0x19c] ss:$12 sps:$4 sm:$0xff]   ;;  %v1867_v60 = vld [vmem:[#allocation8 + $0x18] ss:$12 sps:$4 sm:$0xff]   ;;  %v1873_v0 = vld [vmem:[#allocation8] ss:$12 sps:$4 sm:$0xff]  }
  0x55   :  { %v1870_v61 = vld [vmem:[#allocation8 + $0x198] ss:$12 sps:$4 sm:$0xff]   ;;  %v1876_v1 = vld [vmem:[#allocation8 + $0x180] ss:$12 sps:$4 sm:$0xff]   ;;  %v1879_v4 = vld [vmem:[#allocation8 + $0x168] ss:$12 sps:$4 sm:$0xff]  }
  0x56   :  { %v1875_v62 = vld [vmem:[#allocation8 + $0x4] ss:$12 sps:$4 sm:$0xff]   ;;  %v1881_v2 = vld [vmem:[#allocation8 + $0x16c] ss:$12 sps:$4 sm:$0xff]   ;;  %v1882_v5 = vld [vmem:[#allocation8 + $0x2e8] ss:$12 sps:$4 sm:$0xff]  }
  0x57   :  { %318 = vmatpush1.bf16.msra.mxu0 %v1817_v23  ;;  %359 = vmatpush1.bf16.msra.mxu1 %v1818_v24  ;;  %v1878_v63 = vld [vmem:[#allocation8 + $0x184] ss:$12 sps:$4 sm:$0xff]   ;;  %v1884_v3 = vld [vmem:[#allocation8 + $0x2ec] ss:$12 sps:$4 sm:$0xff]   ;;  %v1887_v6 = vld [vmem:[#allocation8 + $0x154] ss:$12 sps:$4 sm:$0xff]  }
  0x58   :  { %319 = vmatprep.subr.bf16.mxu0 %v1819_v25  ;;  %360 = vmatprep.subr.bf16.mxu1 %v1821_v26  ;;  %v1890_v7 = vld [vmem:[#allocation8 + $0x2d4] ss:$12 sps:$4 sm:$0xff]   ;;  %v1885_v8 = vld [vmem:[#allocation8 + $0x150] ss:$12 sps:$4 sm:$0xff]   ;;  %v1891_v12 = vld [vmem:[#allocation8 + $0x138] ss:$12 sps:$4 sm:$0xff]  }
  0x59   :  { %v1888_v9 = vld [vmem:[#allocation8 + $0x2d0] ss:$12 sps:$4 sm:$0xff]   ;;  %v1894_v13 = vld [vmem:[#allocation8 + $0x2b8] ss:$12 sps:$4 sm:$0xff]   ;;  %v1897_v16 = vld [vmem:[#allocation8 + $0x120] ss:$12 sps:$4 sm:$0xff]  }
  0x5a   :  { %v1893_v10 = vld [vmem:[#allocation8 + $0x13c] ss:$12 sps:$4 sm:$0xff]   ;;  %v1899_v14 = vld [vmem:[#allocation8 + $0x124] ss:$12 sps:$4 sm:$0xff]   ;;  %v1900_v17 = vld [vmem:[#allocation8 + $0x2a0] ss:$12 sps:$4 sm:$0xff]  }
  0x5b   :  { %320 = vmatpush1.bf16.msra.mxu0 %v1823_v27  ;;  %361 = vmatpush1.bf16.msra.mxu1 %v1824_v28  ;;  %v1896_v11 = vld [vmem:[#allocation8 + $0x2bc] ss:$12 sps:$4 sm:$0xff]   ;;  %v1902_v15 = vld [vmem:[#allocation8 + $0x2a4] ss:$12 sps:$4 sm:$0xff]   ;;  %v1905_v18 = vld [vmem:[#allocation8 + $0x10c] ss:$12 sps:$4 sm:$0xff]  }
  0x5c   :  { %321 = vmatprep.subr.bf16.mxu0 %v1825_v29  ;;  %362 = vmatprep.subr.bf16.mxu1 %v1827_v30  ;;  %v1908_v19 = vld [vmem:[#allocation8 + $0x28c] ss:$12 sps:$4 sm:$0xff]   ;;  %v1903_v20 = vld [vmem:[#allocation8 + $0x108] ss:$12 sps:$4 sm:$0xff]   ;;  %v1909_v24 = vld [vmem:[#allocation8 + $0xf0] ss:$12 sps:$4 sm:$0xff]  }
  0x5d   :  { %v1906_v21 = vld [vmem:[#allocation8 + $0x288] ss:$12 sps:$4 sm:$0xff]   ;;  %v1912_v25 = vld [vmem:[#allocation8 + $0x270] ss:$12 sps:$4 sm:$0xff]   ;;  %v1915_v28 = vld [vmem:[#allocation8 + $0xd8] ss:$12 sps:$4 sm:$0xff]  }
  0x5e   :  { %v1911_v22 = vld [vmem:[#allocation8 + $0xf4] ss:$12 sps:$4 sm:$0xff]   ;;  %v1917_v26 = vld [vmem:[#allocation8 + $0xdc] ss:$12 sps:$4 sm:$0xff]   ;;  %v1918_v29 = vld [vmem:[#allocation8 + $0x258] ss:$12 sps:$4 sm:$0xff]  }
  0x5f   :  { %322 = vmatpush1.bf16.msra.mxu0 %v1829_v31  ;;  %363 = vmatpush1.bf16.msra.mxu1 %v1830_v32  ;;  %v1914_v23 = vld [vmem:[#allocation8 + $0x274] ss:$12 sps:$4 sm:$0xff]   ;;  %v1920_v27 = vld [vmem:[#allocation8 + $0x25c] ss:$12 sps:$4 sm:$0xff]   ;;  %v1923_v30 = vld [vmem:[#allocation8 + $0xc4] ss:$12 sps:$4 sm:$0xff]  }
  0x60   :  { %1054 = vmatprep.subr.bf16.mxu0 %v1833_v33  ;;  %1095 = vmatprep.subr.bf16.mxu1 %v1836_v34  ;;  %v1926_v31 = vld [vmem:[#allocation8 + $0x244] ss:$12 sps:$4 sm:$0xff]   ;;  %v1921_v32 = vld [vmem:[#allocation8 + $0xc0] ss:$12 sps:$4 sm:$0xff]   ;;  %s2127_s30 = smov [#allocation11]  }
  0x61   :  { %v1924_v33 = vld [vmem:[#allocation8 + $0x240] ss:$12 sps:$4 sm:$0xff]   ;;  %v1927_v34 = vld [vmem:[#allocation8 + $0x170] ss:$12 sps:$4 sm:$0xff]   ;;  %s1509_s8 = sshll.u32 %s2127_s30, 4  ;;  %s1510_s8 = int_to_ptr.vmem [resolvable:$true] %s1509_s8 }
  0x62   :  { %340 = vmatmul.mubr.bf16.vlgmr.msra.gmra.mxu0 %v92_v35  ;;  %381 = vmatmul.mubr.bf16.vlgmr.msra.gmra.mxu1 %v92_v35  ;;  %v1928_v35 = vld [vmem:[#allocation8 + $0x2f0] ss:$12 sps:$4 sm:$0xff]   ;;  %s2085_s9 = scalar_lea.vmem %s1510_s8, 128  ;;  %p2090_p12 = scmp.lt.s32.totalorder %s1510_s8, %s1510_s8 }
  0x63   :  { %1055 = vmatpush1.bf16.msra.mxu0 %v1831_v36  ;;  %1096 = vmatpush1.bf16.msra.mxu1 %v1834_v37  ;;  %v127_v36 = vlaneseq  ;;  %p2086_p11 = scmp.ne.s32.totalorder %s1510_s8, %s2085_s9  ;;  %p2091_p13 = scmp.lt.s32.totalorder %s2085_s9, %s2085_s9 }
  0x64   :  { %1056 = vmatprep.subr.bf16.mxu0 %v1839_v38  ;;  %1097 = vmatprep.subr.bf16.mxu1 %v1842_v39 }
  0x65   :  { %v2183_v37 = vshrl.u32 %v127_v36, 7  ;;  %v1962_v36 = vld [vmem:[#allocation10 + $0x30] sm:$0xff]   ;;  %p2092_p0 = por %p2091_p13, %p2090_p12 }
  0x67   :  { %1057 = vmatpush1.bf16.msra.mxu0 %v1837_v40  ;;  %1098 = vmatpush1.bf16.msra.mxu1 %v1840_v41  ;;  %v129_v38 = vsub.s32 0, %v2183_v37  ;;  %v137_v39 = vsub.s32 2, %v2183_v37  ;;  %v125_v40 = vld [vmem:[#allocation7] sm:$0xf]  ;;  %v133_v41 = vsub.s32 1, %v2183_v37  ;;  %p2093_p1 = pnand %p2092_p0, %p2086_p11 }
  0x68   :  { %1058 = vmatprep.subr.bf16.mxu0 %v1845_v42  ;;  %1099 = vmatprep.subr.bf16.mxu1 %v1848_v43  ;;  %v141_v42 = vsub.s32 3, %v2183_v37  ;;  %v1648_v37 = vld [vmem:[%s2224_s6] ss:$0 sm:$0xff] }
  0x69   :  { %v130_v43 = vrot.slane %v125_v40, %v129_v38 }
  0x6b   :  { %1059 = vmatpush1.bf16.msra.mxu0 %v1843_v44  ;;  %1100 = vmatpush1.bf16.msra.mxu1 %v1846_v45  ;;  %v138_v44 = vrot.slane %v125_v40, %v137_v39  ;;  %v134_v45 = vrot.slane %v125_v40, %v133_v41 }
  0x6c   :  { %1060 = vmatprep.subr.bf16.mxu0 %v1851_v46  ;;  %1101 = vmatprep.subr.bf16.mxu1 %v1854_v47  ;;  %v142_v46 = vrot.slane %v125_v40, %v141_v42  ;;  %v1963_v40 = vld [vmem:[#allocation10 + $0x68] sm:$0xff]  }
  0x6d   :  { %v1964_v42 = vld [vmem:[#allocation10 + $0x28] sm:$0xff]  }
  0x6f   :  { %1061 = vmatpush1.bf16.msra.mxu0 %v1849_v48  ;;  %1102 = vmatpush1.bf16.msra.mxu1 %v1852_v49 }
  0x70   :  { %1062 = vmatprep.subr.bf16.mxu0 %v1857_v50  ;;  %1103 = vmatprep.subr.bf16.mxu1 %v1860_v51 }
  0x73   :  { %1063 = vmatpush1.bf16.msra.mxu0 %v1855_v52  ;;  %1104 = vmatpush1.bf16.msra.mxu1 %v1858_v53 }
  0x74   :  { %1064 = vmatprep.subr.bf16.mxu0 %v1863_v54  ;;  %1105 = vmatprep.subr.bf16.mxu1 %v1866_v55 }
  0x77   :  { %1065 = vmatpush1.bf16.msra.mxu0 %v1861_v56  ;;  %1106 = vmatpush1.bf16.msra.mxu1 %v1864_v57 }
  0x78   :  { %1066 = vmatprep.subr.bf16.mxu0 %v1869_v58  ;;  %1107 = vmatprep.subr.bf16.mxu1 %v1872_v59 }
  0x7b   :  { %1067 = vmatpush1.bf16.msra.mxu0 %v1867_v60  ;;  %1108 = vmatpush1.bf16.msra.mxu1 %v1870_v61 }
  0x7c   :  { %1068 = vmatprep.subr.bf16.mxu0 %v1875_v62  ;;  %1109 = vmatprep.subr.bf16.mxu1 %v1878_v63 }
  0x7f   :  { %1069 = vmatpush1.bf16.msra.mxu0 %v1873_v0  ;;  %1110 = vmatpush1.bf16.msra.mxu1 %v1876_v1 }
  0x80   :  { %1070 = vmatprep.subr.bf16.mxu0 %v1881_v2  ;;  %1111 = vmatprep.subr.bf16.mxu1 %v1884_v3  ;;  %v1929_v2 = vld [vmem:[#allocation8 + $0xb0] ss:$12 sps:$4 sm:$0xff]  }
  0x81   :  { %v1930_v3 = vld [vmem:[#allocation8 + $0x230] ss:$12 sps:$4 sm:$0xff]  }
  0x83   :  { %1071 = vmatpush2.bf16.msra.mxu0 %v1879_v4  ;;  %1112 = vmatpush2.bf16.msra.mxu1 %v1882_v5  ;;  %v1931_v5 = vld [vmem:[#allocation8 + $0x158] ss:$12 sps:$4 sm:$0xff]  }
  0x84   :  { %1072 = vmatprep.subr.bf16.mxu0 %v1887_v6  ;;  %1113 = vmatprep.subr.bf16.mxu1 %v1890_v7  ;;  %v1932_v6 = vld [vmem:[#allocation8 + $0x2d8] ss:$12 sps:$4 sm:$0xff]  }
  0x85   :  { %v1933_v7 = vld [vmem:[#allocation8 + $0x98] ss:$12 sps:$4 sm:$0xff]  }
  0x87   :  { %1073 = vmatpush2.bf16.msra.mxu0 %v1885_v8  ;;  %1114 = vmatpush2.bf16.msra.mxu1 %v1888_v9  ;;  %v1934_v8 = vld [vmem:[#allocation8 + $0x218] ss:$12 sps:$4 sm:$0xff]   ;;  %v1935_v9 = vld [vmem:[#allocation8 + $0x140] ss:$12 sps:$4 sm:$0xff]  }
  0x88   :  { %1074 = vmatprep.subr.bf16.mxu0 %v1893_v10  ;;  %1115 = vmatprep.subr.bf16.mxu1 %v1896_v11  ;;  %v1936_v10 = vld [vmem:[#allocation8 + $0x2c0] ss:$12 sps:$4 sm:$0xff]  }
  0x89   :  { %v1937_v11 = vld [vmem:[#allocation8 + $0x80] ss:$12 sps:$4 sm:$0xff]  }
  0x8b   :  { %1075 = vmatpush2.bf16.msra.mxu0 %v1891_v12  ;;  %1116 = vmatpush2.bf16.msra.mxu1 %v1894_v13  ;;  %v1938_v12 = vld [vmem:[#allocation8 + $0x200] ss:$12 sps:$4 sm:$0xff]   ;;  %v1939_v13 = vld [vmem:[#allocation8 + $0x128] ss:$12 sps:$4 sm:$0xff]  }
  0x8c   :  { %1076 = vmatprep.subr.bf16.mxu0 %v1899_v14  ;;  %1117 = vmatprep.subr.bf16.mxu1 %v1902_v15  ;;  %v1940_v14 = vld [vmem:[#allocation8 + $0x2a8] ss:$12 sps:$4 sm:$0xff]  }
  0x8d   :  { %v1941_v15 = vld [vmem:[#allocation8 + $0x68] ss:$12 sps:$4 sm:$0xff]  }
  0x8f   :  { %1077 = vmatpush2.bf16.msra.mxu0 %v1897_v16  ;;  %1118 = vmatpush2.bf16.msra.mxu1 %v1900_v17  ;;  %v1942_v16 = vld [vmem:[#allocation8 + $0x1e8] ss:$12 sps:$4 sm:$0xff]   ;;  %v1943_v17 = vld [vmem:[#allocation8 + $0x110] ss:$12 sps:$4 sm:$0xff]  }
  0x90   :  { %1078 = vmatprep.subr.bf16.mxu0 %v1905_v18  ;;  %1119 = vmatprep.subr.bf16.mxu1 %v1908_v19  ;;  %v1944_v18 = vld [vmem:[#allocation8 + $0x290] ss:$12 sps:$4 sm:$0xff]  }
  0x91   :  { %v1945_v19 = vld [vmem:[#allocation8 + $0x50] ss:$12 sps:$4 sm:$0xff]  }
  0x93   :  { %1079 = vmatpush2.bf16.msra.mxu0 %v1903_v20  ;;  %1120 = vmatpush2.bf16.msra.mxu1 %v1906_v21  ;;  %v1946_v20 = vld [vmem:[#allocation8 + $0x1d0] ss:$12 sps:$4 sm:$0xff]   ;;  %v1947_v21 = vld [vmem:[#allocation8 + $0xf8] ss:$12 sps:$4 sm:$0xff]  }
  0x94   :  { %1080 = vmatprep.subr.bf16.mxu0 %v1911_v22  ;;  %1121 = vmatprep.subr.bf16.mxu1 %v1914_v23  ;;  %v1948_v22 = vld [vmem:[#allocation8 + $0x278] ss:$12 sps:$4 sm:$0xff]  }
  0x95   :  { %v1949_v23 = vld [vmem:[#allocation8 + $0x38] ss:$12 sps:$4 sm:$0xff]  }
  0x97   :  { %1081 = vmatpush2.bf16.msra.mxu0 %v1909_v24  ;;  %1122 = vmatpush2.bf16.msra.mxu1 %v1912_v25  ;;  %v1950_v24 = vld [vmem:[#allocation8 + $0x1b8] ss:$12 sps:$4 sm:$0xff]   ;;  %v1951_v25 = vld [vmem:[#allocation8 + $0xe0] ss:$12 sps:$4 sm:$0xff]  }
  0x98   :  { %1082 = vmatprep.subr.bf16.mxu0 %v1917_v26  ;;  %1123 = vmatprep.subr.bf16.mxu1 %v1920_v27  ;;  %v1952_v26 = vld [vmem:[#allocation8 + $0x260] ss:$12 sps:$4 sm:$0xff]  }
  0x99   :  { %v1953_v27 = vld [vmem:[#allocation8 + $0x20] ss:$12 sps:$4 sm:$0xff]  }
  0x9b   :  { %1083 = vmatpush2.bf16.msra.mxu0 %v1915_v28  ;;  %1124 = vmatpush2.bf16.msra.mxu1 %v1918_v29  ;;  %v1954_v28 = vld [vmem:[#allocation8 + $0x1a0] ss:$12 sps:$4 sm:$0xff]   ;;  %v1955_v29 = vld [vmem:[#allocation8 + $0xc8] ss:$12 sps:$4 sm:$0xff]  }
  0x9c   :  { %1084 = vmatprep.subr.bf16.mxu0 %v1923_v30  ;;  %1125 = vmatprep.subr.bf16.mxu1 %v1926_v31  ;;  %v1956_v30 = vld [vmem:[#allocation8 + $0x248] ss:$12 sps:$4 sm:$0xff]  }
  0x9d   :  { %v1957_v31 = vld [vmem:[#allocation8 + $0x8] ss:$12 sps:$4 sm:$0xff]  }
  0x9f   :  { %1085 = vmatpush2.bf16.msra.mxu0 %v1921_v32  ;;  %1126 = vmatpush2.bf16.msra.mxu1 %v1924_v33  ;;  %v1958_v32 = vld [vmem:[#allocation8 + $0x188] ss:$12 sps:$4 sm:$0xff]   ;;  %v1959_v33 = vld [vmem:[#allocation10 + $0x78] sm:$0xff]  }
  0xa0   :  { %1673 = vmatprep.subr.bf16.mxu0 %v1927_v34  ;;  %1695 = vmatprep.subr.bf16.mxu1 %v1928_v35  ;;  %v1960_v34 = vld [vmem:[#allocation10 + $0x38] sm:$0xff]   ;;  %v1961_v35 = vld [vmem:[#allocation10 + $0x70] sm:$0xff]  }
 0x122   :  { %v341_v47 = vpop.f32.mrf.mxu0  ;;  %v382_v48 = vpop.f32.mrf.mxu1 }
 0x123   :  { %v342_v49 = vadd.f32 %v341_v47, %v130_v43  ;;  %v383_v50 = vadd.f32 %v382_v48, %v138_v44  ;;  %v1965_v43 = vld [vmem:[#allocation10 + $0x60] sm:$0xff]   ;;  %v1969_v47 = vld [vmem:[#allocation10 + $0x50] sm:$0xff]  }
 0x124   :  { %v343_v51 = vpop.f32.mrf.mxu0  ;;  %v384_v52 = vpop.f32.mrf.mxu1  ;;  %v1966_v44 = vld [vmem:[#allocation10 + $0x20] sm:$0xff]   ;;  %v1970_v48 = vld [vmem:[#allocation10 + $0x10] sm:$0xff]  }
 0x125   :  { %v391_v53 = vmax.f32 %v383_v50, 0.0  ;;  %v344_v54 = vadd.f32 %v343_v51, %v134_v45  ;;  %v385_v55 = vadd.f32 %v384_v52, %v142_v46  ;;  %v389_v56 = vmax.f32 %v342_v49, 0.0  ;;  %v1967_v45 = vld [vmem:[#allocation10 + $0x58] sm:$0xff]   ;;  %v1971_v49 = vld [vmem:[#allocation10 + $0x48] sm:$0xff]   ;;  %v1973_v51 = vld [vmem:[#allocation10 + $0x40] sm:$0xff]  }
 0x126   :  { %v345_v57 = vpop.f32.mrf.mxu0  ;;  %v386_v58 = vpop.f32.mrf.mxu1  ;;  %v1968_v46 = vld [vmem:[#allocation10 + $0x18] sm:$0xff]   ;;  %v1972_v50 = vld [vmem:[#allocation10 + $0x8] sm:$0xff]   ;;  %v1974_v52 = vld [vmem:[#allocation10] sm:$0xff]  }
 0x127   :  { %v390_v59 = vmax.f32 %v344_v54, 0.0  ;;  %v392_v60 = vmax.f32 %v385_v55, 0.0  ;;  %v2195_v61 = vpack.c.bf16 %v391_v53, %v391_v53  ;;  %v2197_v4 = vpack.c.bf16 %v389_v56, %v389_v56  ;;  %v1975_v53 = vld [vmem:[#allocation10 + $0xb8] sm:$0xff]   ;;  %v1976_v55 = vld [vmem:[#allocation10 + $0xb0] sm:$0xff]   ;;  %v1977_v56 = vld [vmem:[#allocation10 + $0xa8] sm:$0xff]  }
 0x128   :  { %v346_v62 = vpop.f32.mrf.mxu0  ;;  %v387_v63 = vpop.f32.mrf.mxu1  ;;  %v2125_v54 = vmov 0.0   ;;  %v1978_v57 = vld [vmem:[#allocation10 + $0xa0] sm:$0xff]   ;;  %v1979_v58 = vld [vmem:[#allocation10 + $0x98] sm:$0xff]  }
 0x129   :  { %v394_v0 = vpack.c.bf16 %v390_v59, %v390_v59  ;;  %v396_v1 = vpack.c.bf16 %v392_v60, %v392_v60  ;;  %v1980_v59 = vld [vmem:[#allocation10 + $0x90] sm:$0xff]   ;;  %v1981_v60 = vld [vmem:[#allocation10 + $0x88] sm:$0xff]   ;;  %v525_v62 = vld [vmem:[%s2222_s4] sm:$0x7] }
 0x12a   :  { %v530_v63 = vrot.slane %v525_v62, %v129_v38 }
 0x12b   :  { %1086 = vmatprep.mubr.bf16.mxu0 %v394_v0  ;;  %1127 = vmatprep.mubr.bf16.mxu1 %v396_v1 }
 0x12c   :  { %1087 = vmatmul.mubr.bf16.vlgmr.msra.gmra.mxu0 %v2197_v4  ;;  %1128 = vmatmul.mubr.bf16.vlgmr.msra.gmra.mxu1 %v2195_v61 }
 0x12d   :  { %1674 = vmatpush3.bf16.msra.mxu0 %v1929_v2  ;;  %1696 = vmatpush3.bf16.msra.mxu1 %v1930_v3 }
 0x12e   :  { %1168 = vmatprep.mubr.bf16.mxu0 %v394_v0  ;;  %1208 = vmatprep.mubr.bf16.mxu1 %v396_v1  ;;  %v534_v0 = vrot.slane %v525_v62, %v133_v41 }
 0x12f   :  { %1675 = vmatprep.subr.bf16.mxu0 %v1931_v5  ;;  %1697 = vmatprep.subr.bf16.mxu1 %v1932_v6 }
 0x131   :  { %1676 = vmatpush3.bf16.msra.mxu0 %v1933_v7  ;;  %1698 = vmatpush3.bf16.msra.mxu1 %v1934_v8 }
 0x132   :  { %1677 = vmatprep.subr.bf16.mxu0 %v1935_v9  ;;  %1699 = vmatprep.subr.bf16.mxu1 %v1936_v10 }
 0x135   :  { %1678 = vmatpush3.bf16.msra.mxu0 %v1937_v11  ;;  %1700 = vmatpush3.bf16.msra.mxu1 %v1938_v12 }
 0x136   :  { %1679 = vmatprep.subr.bf16.mxu0 %v1939_v13  ;;  %1701 = vmatprep.subr.bf16.mxu1 %v1940_v14 }
 0x139   :  { %1680 = vmatpush3.bf16.msra.mxu0 %v1941_v15  ;;  %1702 = vmatpush3.bf16.msra.mxu1 %v1942_v16 }
 0x13a   :  { %1681 = vmatprep.subr.bf16.mxu0 %v1943_v17  ;;  %1703 = vmatprep.subr.bf16.mxu1 %v1944_v18  ;;  %v538_v17 = vrot.slane %v525_v62, %v137_v39 }
 0x13d   :  { %1682 = vmatpush3.bf16.msra.mxu0 %v1945_v19  ;;  %1704 = vmatpush3.bf16.msra.mxu1 %v1946_v20 }
 0x13e   :  { %1683 = vmatprep.subr.bf16.mxu0 %v1947_v21  ;;  %1705 = vmatprep.subr.bf16.mxu1 %v1948_v22 }
 0x141   :  { %1684 = vmatpush3.bf16.msra.mxu0 %v1949_v23  ;;  %1706 = vmatpush3.bf16.msra.mxu1 %v1950_v24 }
 0x142   :  { %1685 = vmatprep.subr.bf16.mxu0 %v1951_v25  ;;  %1707 = vmatprep.subr.bf16.mxu1 %v1952_v26 }
 0x145   :  { %1686 = vmatpush3.bf16.msra.mxu0 %v1953_v27  ;;  %1708 = vmatpush3.bf16.msra.mxu1 %v1954_v28 }
 0x146   :  { %1687 = vmatprep.subr.bf16.mxu0 %v1955_v29  ;;  %1709 = vmatprep.subr.bf16.mxu1 %v1956_v30 }
 0x149   :  { %1688 = vmatpush3.bf16.msra.mxu0 %v1957_v31  ;;  %1710 = vmatpush3.bf16.msra.mxu1 %v1958_v32 }
 0x14a   :  { %1717 = vmatprep.subr.bf16.mxu0 %v1959_v33  ;;  %1748 = vmatprep.subr.bf16.mxu1 %v2125_v54 }
 0x14c   :  { %1169 = vmatmul.mubr.bf16.vlgmr.msra.gmra.mxu0 %v2197_v4  ;;  %1209 = vmatmul.mubr.bf16.vlgmr.msra.gmra.mxu1 %v2195_v61  ;;  %v1982_v61 = vld [vmem:[#allocation10 + $0x80] sm:$0xff]  }
 0x14d   :  { %1718 = vmatpush3.bf16.msra.mxu0 %v1960_v34  ;;  %1749 = vmatpush3.bf16.msra.mxu1 %v1975_v53 }
 0x14e   :  { %1719 = vmatprep.subr.bf16.mxu0 %v1961_v35  ;;  %1750 = vmatprep.subr.bf16.mxu1 %v2125_v54 }
 0x14f   :  { %1764 = vmatprep.mubr.msk.bf16.mxu1 %vm2126_vm0, %v2125_v54 }
 0x151   :  { %1720 = vmatpush3.bf16.msra.mxu0 %v1962_v36  ;;  %1751 = vmatpush3.bf16.msra.mxu1 %v1976_v55 }
 0x152   :  { %1721 = vmatprep.subr.bf16.mxu0 %v1963_v40  ;;  %1752 = vmatprep.subr.bf16.mxu1 %v2125_v54 }
 0x155   :  { %1722 = vmatpush3.bf16.msra.mxu0 %v1964_v42  ;;  %1753 = vmatpush3.bf16.msra.mxu1 %v1977_v56 }
 0x156   :  { %1723 = vmatprep.subr.bf16.mxu0 %v1965_v43  ;;  %1754 = vmatprep.subr.bf16.mxu1 %v2125_v54 }
 0x159   :  { %1724 = vmatpush3.bf16.msra.mxu0 %v1966_v44  ;;  %1755 = vmatpush3.bf16.msra.mxu1 %v1978_v57 }
 0x15a   :  { %1725 = vmatprep.subr.bf16.mxu0 %v1967_v45  ;;  %1756 = vmatprep.subr.bf16.mxu1 %v2125_v54 }
 0x15d   :  { %1726 = vmatpush3.bf16.msra.mxu0 %v1968_v46  ;;  %1757 = vmatpush3.bf16.msra.mxu1 %v1979_v58 }
 0x15e   :  { %1727 = vmatprep.subr.bf16.mxu0 %v1969_v47  ;;  %1758 = vmatprep.subr.bf16.mxu1 %v2125_v54 }
 0x161   :  { %1728 = vmatpush3.bf16.msra.mxu0 %v1970_v48  ;;  %1759 = vmatpush3.bf16.msra.mxu1 %v1980_v59 }
 0x162   :  { %1729 = vmatprep.subr.bf16.mxu0 %v1971_v49  ;;  %1760 = vmatprep.subr.bf16.mxu1 %v2125_v54 }
 0x165   :  { %1730 = vmatpush3.bf16.msra.mxu0 %v1972_v50  ;;  %1761 = vmatpush3.bf16.msra.mxu1 %v1981_v60 }
 0x166   :  { %1731 = vmatprep.subr.bf16.mxu0 %v1973_v51  ;;  %1762 = vmatprep.subr.bf16.mxu1 %v2125_v54 }
 0x169   :  { %1732 = vmatpush3.bf16.msra.mxu0 %v1974_v52  ;;  %1763 = vmatpush3.bf16.msra.mxu1 %v1982_v61 }
 0x1ec   :  { %v1088_v1 = vpop.f32.mrf.mxu0  ;;  %v1129_v2 = vpop.f32.mrf.mxu1 }
 0x1ed   :  { %v1089_v3 = vadd.f32 %v1088_v1, %v530_v63 }
 0x1ee   :  { %v1090_v4 = vpop.f32.mrf.mxu0  ;;  %v1131_v5 = vpop.f32.mrf.mxu1 }
 0x1ef   :  { %v1130_v6 = vadd.f32 %v1129_v2, %v1089_v3  ;;  %v1091_v7 = vadd.f32 %v1090_v4, %v534_v0 }
 0x1f0   :  { %v1092_v8 = vpop.f32.mrf.mxu0  ;;  %v1133_v9 = vpop.f32.mrf.mxu1 }
 0x1f1   :  { %v1132_v10 = vadd.f32 %v1131_v5, %v1091_v7  ;;  %v1216_v11 = vmax.f32 %v1130_v6, 0.0 }
 0x1f2   :  { %v1093_v12 = vpop.f32.mrf.mxu0  ;;  %v1134_v13 = vpop.f32.mrf.mxu1 }
 0x1f3   :  { %v1217_v14 = vmax.f32 %v1132_v10, 0.0  ;;  %v1219_v16 = vpack.c.bf16 %v1216_v11, %v1216_v11 }
 0x1f5   :  { %v1220_v15 = vpack.c.bf16 %v1217_v14, %v1217_v14 }
 0x1f7   :  { %1453 = vmatprep.mubr.bf16.mxu0 %v1220_v15 }
 0x1f8   :  { %1454 = vmatmul.mubr.bf16.vlgmr.msra.gmra.mxu0 %v1219_v16 }
 0x20c   :  { %v1689_v38 = vpop.f32.mrf.mxu0  ;;  %v1711_v41 = vpop.f32.mrf.mxu1 }
 0x20e   :  { %v1690_v18 = vpop.f32.mrf.mxu0  ;;  %v1712_v19 = vpop.f32.mrf.mxu1 }
 0x20f   :  { %v1691_v20 = vadd.f32 %v1690_v18, %v1689_v38  ;;  %v1713_v24 = vadd.f32 %v1712_v19, %v1711_v41 }
 0x210   :  { %v1692_v21 = vpop.f32.mrf.mxu0  ;;  %v1714_v22 = vpop.f32.mrf.mxu1 }
 0x211   :  { %v1171_v23 = vadd.f32 %v1691_v20, %v538_v17 }
 0x212   :  { %v1693_v25 = vpop.f32.mrf.mxu0  ;;  %v1715_v26 = vpop.f32.mrf.mxu1 }
 0x213   :  { %v1211_v27 = vadd.f32 %v1713_v24, %v1171_v23 }
 0x215   :  { %v1218_v28 = vmax.f32 %v1211_v27, 0.0 }
 0x217   :  { %v1221_v29 = vpack.c.bf16 %v1218_v28, %v1218_v28 }
 0x219   :  { %1765 = vmatmul.mubr.bf16.vlgmr.msra.gmra.mxu1 %v1221_v29 }
 0x2b8   :  { %v1733_v30 = vpop.f32.mrf.mxu0 }
 0x2ba   :  { %v1734_v31 = vpop.f32.mrf.mxu0 }
 0x2bb   :  { %v1735_v34 = vadd.f32 %v1734_v31, %v1733_v30 }
 0x2bc   :  { %v1736_v32 = vpop.f32.mrf.mxu0 }
 0x2bd   :  { %v1456_v39 = vadd.f32 %v1735_v34, %v1648_v37 }
 0x2be   :  { %v1737_v33 = vpop.f32.mrf.mxu0 }
 0x2d9   :  { %v1495_v35 = vpop.f32.mrf.mxu1 }
 0x2da   :  { %v1496_v36 = vadd.f32 %v1495_v35, %v1456_v39 }
 0x2db   :  { %v1766_v40 = vpop.f32.mrf.mxu1 }
 0x2dc   :  { %1983 = vtanh.f32 %v1496_v36 }
 0x2dd   :  { %v1498_v42 = vpop.f32.mrf.mxu1 }
 0x2df   :  { %v1767_v43 = vpop.f32.mrf.mxu1 }
 0x2e9   :  { %v1984_v44 = vpop.eup %1983 }
 0x2ea   :  { %1502 = vst [vmem:[#allocation11] sm:$0xff] %v1984_v44 }
 0x2eb   :  { %2096 = shalt.err (!%p2093_p1)
}
 0x2ec   :  { %1512 = dma.vmem_to_hbm [thread:$0]  %s1510_s8, 128, %s2225_s7, [#allocation4]  }
 0x2ed   :  { %2111 = dma.done.wait [#allocation4], 128  }
 0x2ee   :  { %2112 = vsyncadd [#allocation4], 4294967168 }
 0x2ef   :  { %1516 = vsyncpa [#allocation3], 1 }
 0x2f0   :  { %1517 = vsyncpa [#allocation6], 1 }
 0x2f1   :  { %1518 = vsyncpa [#allocation9], 1 }
 0x2f2   :  { %1519 = vsyncpa [#allocation4], 1 }

</bundles_post_ra>
